<compile_context>
chip_gen: v7x
topology: tpu7x:2x2x1
jax: 0.10.0
libtpu: 0.0.40
codegen_flags: <defaults>
</compile_context>

<pallas_src>
import jax
import jax.numpy as jnp
from jax import lax
from jax.experimental import pallas as pl
from jax.experimental.pallas import tpu as pltpu

EPS = 1e-5


def _round_up(v, m):
    return (v + m - 1) // m * m


# ---------------------------------------------------------------------------
# Pallas kernel
# ---------------------------------------------------------------------------
def _spatial_attn_kernel(scal_ref, x_ref, w_ref, g_ref, up_ref, out_ref):
    """SpatialAttn forward for a tile of `bt` images.

    scal_ref : (2,)          f32  SMEM  [conv1 bias+BN1 shift, conv2 bias+BN2 shift]
    x_ref    : (bt, C, H*W)  f32        producer's NCHW activations (spatial
                                        flattened onto lanes; no relayout done)
    w_ref    : (9, C)        bf16       conv1 taps (ky*3+kx major), BN1 scale folded
    g_ref    : (9, H*W, Q)   bf16       exact 0/1 stride-2 tap-gather matrices
                                        (border zero-padding encoded as empty cols)
    up_ref   : (Q, 4*Q)      f32        bilinear x2 align_corners=True interp matrix
                                        with conv2_weight*BN2_scale folded in
    out_ref  : (1, bt, 4*Q)  f32        sigmoid attention map, lane-dense
    """
    bt = x_ref.shape[0]
    q = g_ref.shape[2]

    w = w_ref[...]                                                  # (9, C) bf16

    # conv1 channel contraction straight off the NC(HW) layout: C is already the
    # sublane/contraction axis, so no host- or VMEM-side transpose is needed.
    # One bf16 MXU matmul per image, f32 accumulation.
    contrib = jnp.stack(
        [jnp.dot(w, x_ref[b].astype(jnp.bfloat16),
                 preferred_element_type=jnp.float32) for b in range(bt)],
        axis=0)                                                     # (bt, 9, HW)

    # conv1's 3x3 / stride-2 / pad-1 spatial tap gather (with exact zero padding
    # at the borders) as 9 tiny matmuls against 0/1 matrices.  The matrices are
    # stored bf16 (0/1 is exact) and upcast, so the gather itself is exact f32.
    s = jnp.zeros((bt, q), jnp.float32)
    for t in range(9):
        g_t = g_ref[t].astype(jnp.float32)                          # (HW, Q)
        s = s + jnp.dot(contrib[:, t, :], g_t,
                        preferred_element_type=jnp.float32)

    # conv1 bias + BatchNorm1 (eval) folded into one scalar shift, then ReLU.
    s = jnp.maximum(s + scal_ref[0], 0.0)                           # (bt, Q)

    # Bilinear x2 upsample (align_corners=True) + conv2 weight * BN2 scale,
    # all folded into a single (Q, 4Q) matrix -> result is already lane-dense.
    u = jnp.dot(s, up_ref[...], preferred_element_type=jnp.float32)  # (bt, 4Q)

    # conv2 bias + BN2 shift, sigmoid, lane-dense store.
    out_ref[0] = jax.nn.sigmoid(u + scal_ref[1])


# ---------------------------------------------------------------------------
# Host-side constant builders (run once, outside the jitted forward)
# ---------------------------------------------------------------------------
def _interp_matrix(out_size, in_size):
    # Bilinear interpolation matrix, align_corners=True semantics.
    i = jnp.arange(out_size, dtype=jnp.float32)
    if out_size == 1:
        src = jnp.zeros_like(i)
    else:
        src = i * (in_size - 1) / (out_size - 1)
    i0 = jnp.floor(src).astype(jnp.int32)
    i1 = jnp.minimum(i0 + 1, in_size - 1)
    frac = src - i0.astype(jnp.float32)
    m = jnp.zeros((out_size, in_size), jnp.float32)
    rows = jnp.arange(out_size)
    m = m.at[rows, i0].add(1.0 - frac)
    m = m.at[rows, i1].add(frac)
    return m


def _upsample_matrix(oh, ow):
    # Fused (OH*OW, 2OH*2OW) interpolation matrix: exact x2 align_corners=True.
    uy = _interp_matrix(2 * oh, oh)                 # (2OH, OH)
    ux = _interp_matrix(2 * ow, ow)                 # (2OW, OW)
    return jnp.einsum("Ih,Jw->hwIJ", uy, ux).reshape(oh * ow, 4 * oh * ow)


def _gather_matrices(h, w, oh, ow):
    # G[t, n, q] = 1 iff input pixel n=(hh,ww) is tap t=(ky,kx) of output pixel
    # q=(oo,pp) for the 3x3 / stride-2 / pad-1 conv, i.e. hh == 2*oo-1+ky and
    # ww == 2*pp-1+kx.  Out-of-range sources simply have no matching n, which
    # reproduces the zero padding at the image border exactly.
    ky = jnp.arange(3).reshape(3, 1, 1, 1, 1, 1)
    kx = jnp.arange(3).reshape(1, 3, 1, 1, 1, 1)
    hh = jnp.arange(h).reshape(1, 1, h, 1, 1, 1)
    ww = jnp.arange(w).reshape(1, 1, 1, w, 1, 1)
    oo = jnp.arange(oh).reshape(1, 1, 1, 1, oh, 1)
    pp = jnp.arange(ow).reshape(1, 1, 1, 1, 1, ow)
    hit = (hh == 2 * oo - 1 + ky) & (ww == 2 * pp - 1 + kx)
    # 0/1 is exactly representable in bf16 -> halves HBM/VMEM for this constant.
    return hit.reshape(9, h * w, oh * ow).astype(jnp.bfloat16)


# ---------------------------------------------------------------------------
# Parameters (eval-mode BatchNorm folded into per-stage affines)
# ---------------------------------------------------------------------------
def init_params(key, cin=256):
    k1, k2 = jax.random.split(key)
    fan_in1 = cin * 3 * 3
    w1 = jax.random.normal(k1, (3, 3, cin), jnp.float32) * jnp.sqrt(2.0 / fan_in1)
    b1 = 0.0                                        # conv bias init 0
    g1, be1, m1, v1 = 1.0, 0.0, 0.0, 1.0            # BN1 (eval)
    w2 = jax.random.normal(k2, (), jnp.float32) * jnp.sqrt(2.0)   # 1x1, fan_in=1
    b2 = 0.0
    g2, be2, m2, v2 = 1.0, 0.0, 0.0, 1.0            # BN2 (eval)

    scale1 = g1 / jnp.sqrt(v1 + EPS)
    shift1 = be1 + (b1 - m1) * scale1
    scale2 = g2 / jnp.sqrt(v2 + EPS)
    a2 = w2 * scale2
    c2 = be2 + (b2 - m2) * scale2
    scalars = jnp.array([scale1, shift1, a2, c2], jnp.float32)
    return {"w1": w1, "scalars": scalars}


def build_operands(params, x_shape):
    """Fold BN into weights and build all static kernel constants once."""
    _, c, h, w = x_shape
    oh = (h - 1) // 2 + 1                           # PyTorch conv output size
    ow = (w - 1) // 2 + 1
    sc = params["scalars"]                          # [scale1, shift1, a2, c2]
    wtaps = (params["w1"] * sc[0]).reshape(9, c).astype(jnp.bfloat16)
    gather = _gather_matrices(h, w, oh, ow)                        # (9, HW, Q) bf16
    up = (_upsample_matrix(oh, ow) * sc[2]).astype(jnp.float32)    # (Q, 4Q) f32
    smem = jnp.stack([sc[1], sc[3]]).astype(jnp.float32)           # remaining shifts
    return {"wtaps": wtaps, "gather": gather, "up": up, "smem": smem}


# ---------------------------------------------------------------------------
# Forward (wrapper): PyTorch-style NCHW in, NCHW (B, 1, 2*OH, 2*OW) out
# ---------------------------------------------------------------------------
@jax.jit
def spatial_attn_forward(x_nchw, ops):
    B, C, H, W = x_nchw.shape
    OH = (H - 1) // 2 + 1
    OW = (W - 1) // 2 + 1
    Q = OH * OW
    HW = H * W

    # Batch tile: big enough to amortize per-grid-step overhead, but always at
    # least 2 grid steps when B >= 2 so both v7x TensorCores get a "parallel"
    # step; v5e/v6e are unaffected.
    per_image = C * HW * 4
    bt = max(1, min(B, (8 * 1024 * 1024) // max(per_image, 1)))
    if B >= 2:
        bt = min(bt, max(1, B // 2))
    while B % bt:
        bt -= 1
    grid = B // bt

    # Free, contiguous reshape only (no transpose / extra HBM pass): the kernel
    # consumes the producer's NCHW layout directly.
    x3 = x_nchw.astype(jnp.float32).reshape(B, C, HW)

    # VMEM budget: double-buffered activation/output blocks + (lane-padded,
    # double-buffered) constants + generous scratch headroom.
    blk_x = bt * C * _round_up(HW, 128) * 4
    blk_out = bt * _round_up(4 * Q, 128) * 4
    const_b = (_round_up(9, 16) * _round_up(C, 128) * 2            # wtaps bf16
               + 9 * _round_up(HW, 16) * _round_up(Q, 128) * 2     # gather bf16
               + _round_up(Q, 8) * _round_up(4 * Q, 128) * 4)      # upsample f32
    vmem_limit = int(min(110 * 1024 * 1024,
                         max(32 * 1024 * 1024,
                             2 * (blk_x + blk_out + const_b) + (16 << 20))))

    out = pl.pallas_call(
        _spatial_attn_kernel,
        out_shape=jax.ShapeDtypeStruct((grid, bt, 4 * Q), jnp.float32),
        grid=(grid,),
        in_specs=[
            pl.BlockSpec(memory_space=pltpu.MemorySpace.SMEM),        # scalars
            pl.BlockSpec((bt, C, HW), lambda g: (g, 0, 0)),           # activations
            pl.BlockSpec((9, C), lambda g: (0, 0)),                   # conv1 taps
            pl.BlockSpec((9, HW, Q), lambda g: (0, 0, 0)),            # tap gather
            pl.BlockSpec((Q, 4 * Q), lambda g: (0, 0)),               # upsample
        ],
        out_specs=pl.BlockSpec((1, bt, 4 * Q), lambda g: (g, 0, 0)),
        compiler_params=pltpu.CompilerParams(
            # batch-tile axis is independent -> megacore-shardable on v7x
            dimension_semantics=("parallel",),
            vmem_limit_bytes=vmem_limit,
        ),
    )(ops["smem"], x3, ops["wtaps"], ops["gather"], ops["up"])

    return out.reshape(B, 1, 2 * OH, 2 * OW)        # NCHW attention mask


# ---------------------------------------------------------------------------
# Pure-JAX reference (PyTorch eval-mode semantics)
# ---------------------------------------------------------------------------
def reference_forward(x_nchw, params, *, bf16_inputs=False):
    sc = params["scalars"]
    w1 = params["w1"] * sc[0]                       # BN1 scale folded, as in kernel
    x = x_nchw.astype(jnp.float32)
    if bf16_inputs:
        # Mirror the kernel's bf16 MXU inputs for the conv channel contraction.
        x = x.astype(jnp.bfloat16).astype(jnp.float32)
        w1 = w1.astype(jnp.bfloat16).astype(jnp.float32)
    w_oihw = jnp.transpose(w1, (2, 0, 1))[None]     # (1, C, 3, 3)
    s = lax.conv_general_dilated(
        x, w_oihw, (2, 2), ((1, 1), (1, 1)),
        dimension_numbers=("NCHW", "OIHW", "NCHW"),
        precision=lax.Precision.HIGHEST)
    s = jnp.maximum(s + sc[1], 0.0)
    OH, OW = s.shape[2], s.shape[3]
    uy = _interp_matrix(2 * OH, OH)
    ux = _interp_matrix(2 * OW, OW)
    up = jnp.einsum("oi,bcij,pj->bcop", uy, s, ux,
                    precision=lax.Precision.HIGHEST)
    return jax.nn.sigmoid(up * sc[2] + sc[3])


if __name__ == "__main__":
    key = jax.random.PRNGKey(0)
    kx, kp = jax.random.split(key)
    B, C, H, W = 2, 256, 16, 16                     # SpatialAttn expects 256 channels
    x = jax.random.normal(kx, (B, C, H, W), jnp.float32)
    params = init_params(kp, cin=C)
    ops = build_operands(params, x.shape)

    out = jax.block_until_ready(spatial_attn_forward(x, ops))
    assert out.shape == (B, 1, H, W), out.shape

    # Check against a reference with the same bf16 quantization of the conv1
    # inputs/weights as the kernel's MXU operands (validates the kernel math).
    ref_bf16 = reference_forward(x, params, bf16_inputs=True)
    err = float(jnp.max(jnp.abs(out - ref_bf16)))
    assert jnp.allclose(out, ref_bf16, atol=5e-3, rtol=5e-3), err

    # Loose sanity check against the full-f32 PyTorch-eval semantics; the bf16
    # conv inputs of a sigmoid attention mask stay well inside this bound.
    ref_f32 = reference_forward(x, params, bf16_inputs=False)
    err32 = float(jnp.max(jnp.abs(out - ref_f32)))
    assert jnp.allclose(out, ref_f32, atol=2e-2, rtol=2e-2), err32

    print("KERNEL_OK")
</pallas_src>

<mosaic_0001>
module attributes {stable_mosaic.version = 11 : i64} {
  func.func @_spatial_attn_kernel(%arg0: i32, %arg1: memref<2xf32, #tpu.memory_space<smem>>, %arg2: memref<1x256x256xf32, #tpu.memory_space<vmem>>, %arg3: memref<9x256xbf16, #tpu.memory_space<vmem>>, %arg4: memref<9x256x64xbf16, #tpu.memory_space<vmem>>, %arg5: memref<64x256xf32, #tpu.memory_space<vmem>>, %arg6: memref<1x1x256xf32, #tpu.memory_space<vmem>>) attributes {dimension_semantics = [#tpu.dimension_semantics<parallel>], iteration_bounds = array<i64: 2>, scalar_prefetch = 0 : i64, scratch_operands = 0 : i64, tpu.core_type = #tpu.core_type<tc>, window_params = [{transform_indices = @transform_0, window_bounds = array<i64: 2>}, {transform_indices = @transform_1, window_bounds = array<i64: 1, 256, 256>}, {pipeline_mode = #tpu.pipeline_mode<synchronous>, transform_indices = @transform_2, window_bounds = array<i64: 9, 256>}, {pipeline_mode = #tpu.pipeline_mode<synchronous>, transform_indices = @transform_3, window_bounds = array<i64: 9, 256, 64>}, {pipeline_mode = #tpu.pipeline_mode<synchronous>, transform_indices = @transform_4, window_bounds = array<i64: 64, 256>}, {transform_indices = @transform_5, window_bounds = array<i64: 1, 1, 256>}]} {
    %c0 = arith.constant 0 : index
    %c0_0 = arith.constant 0 : index
    %0 = vector.load %arg3[%c0, %c0_0] : memref<9x256xbf16, #tpu.memory_space<vmem>>, vector<9x256xbf16>
    %c0_1 = arith.constant 0 : index
    %c0_2 = arith.constant 0 : index
    %c0_3 = arith.constant 0 : index
    %1 = vector.load %arg2[%c0_1, %c0_2, %c0_3] : memref<1x256x256xf32, #tpu.memory_space<vmem>>, vector<1x256x256xf32>
    %2 = vector.shape_cast %1 : vector<1x256x256xf32> to vector<256x256xf32>
    %3 = arith.truncf %2 : vector<256x256xf32> to vector<256x256xbf16>
    %cst = arith.constant dense<0.000000e+00> : vector<9x256xf32>
    %4 = tpu.matmul %0, %3, %cst {dimension_numbers = #tpu.dot_dimension_numbers<[1], [0], [0], [1], [0, 0, 1, 1], [], []>} : vector<9x256xbf16>, vector<256x256xbf16>, vector<9x256xf32> -> vector<9x256xf32>
    %5 = vector.shape_cast %4 : vector<9x256xf32> to vector<1x9x256xf32>
    %cst_4 = arith.constant 0.000000e+00 : f32
    %6 = vector.broadcast %cst_4 : f32 to vector<1x64xf32>
    %c0_5 = arith.constant 0 : index
    %c0_6 = arith.constant 0 : index
    %c0_7 = arith.constant 0 : index
    %7 = vector.load %arg4[%c0_5, %c0_6, %c0_7] : memref<9x256x64xbf16, #tpu.memory_space<vmem>>, vector<1x256x64xbf16>
    %8 = vector.shape_cast %7 : vector<1x256x64xbf16> to vector<256x64xbf16>
    %9 = arith.extf %8 : vector<256x64xbf16> to vector<256x64xf32>
    %10 = vector.extract_strided_slice %5 {offsets = [0, 0, 0], sizes = [1, 1, 256], strides = [1, 1, 1]} : vector<1x9x256xf32> to vector<1x1x256xf32>
    %11 = vector.shape_cast %10 : vector<1x1x256xf32> to vector<1x256xf32>
    %cst_8 = arith.constant dense<0.000000e+00> : vector<1x64xf32>
    %12 = tpu.matmul %11, %9, %cst_8 {dimension_numbers = #tpu.dot_dimension_numbers<[1], [0], [0], [1], [0, 0, 1, 1], [], []>} : vector<1x256xf32>, vector<256x64xf32>, vector<1x64xf32> -> vector<1x64xf32>
    %13 = arith.addf %6, %12 : vector<1x64xf32>
    %c1 = arith.constant 1 : index
    %c0_9 = arith.constant 0 : index
    %c0_10 = arith.constant 0 : index
    %14 = vector.load %arg4[%c1, %c0_9, %c0_10] : memref<9x256x64xbf16, #tpu.memory_space<vmem>>, vector<1x256x64xbf16>
    %15 = vector.shape_cast %14 : vector<1x256x64xbf16> to vector<256x64xbf16>
    %16 = arith.extf %15 : vector<256x64xbf16> to vector<256x64xf32>
    %17 = vector.extract_strided_slice %5 {offsets = [0, 1, 0], sizes = [1, 1, 256], strides = [1, 1, 1]} : vector<1x9x256xf32> to vector<1x1x256xf32>
    %18 = vector.shape_cast %17 : vector<1x1x256xf32> to vector<1x256xf32>
    %cst_11 = arith.constant dense<0.000000e+00> : vector<1x64xf32>
    %19 = tpu.matmul %18, %16, %cst_11 {dimension_numbers = #tpu.dot_dimension_numbers<[1], [0], [0], [1], [0, 0, 1, 1], [], []>} : vector<1x256xf32>, vector<256x64xf32>, vector<1x64xf32> -> vector<1x64xf32>
    %20 = arith.addf %13, %19 : vector<1x64xf32>
    %c2 = arith.constant 2 : index
    %c0_12 = arith.constant 0 : index
    %c0_13 = arith.constant 0 : index
    %21 = vector.load %arg4[%c2, %c0_12, %c0_13] : memref<9x256x64xbf16, #tpu.memory_space<vmem>>, vector<1x256x64xbf16>
    %22 = vector.shape_cast %21 : vector<1x256x64xbf16> to vector<256x64xbf16>
    %23 = arith.extf %22 : vector<256x64xbf16> to vector<256x64xf32>
    %24 = vector.extract_strided_slice %5 {offsets = [0, 2, 0], sizes = [1, 1, 256], strides = [1, 1, 1]} : vector<1x9x256xf32> to vector<1x1x256xf32>
    %25 = vector.shape_cast %24 : vector<1x1x256xf32> to vector<1x256xf32>
    %cst_14 = arith.constant dense<0.000000e+00> : vector<1x64xf32>
    %26 = tpu.matmul %25, %23, %cst_14 {dimension_numbers = #tpu.dot_dimension_numbers<[1], [0], [0], [1], [0, 0, 1, 1], [], []>} : vector<1x256xf32>, vector<256x64xf32>, vector<1x64xf32> -> vector<1x64xf32>
    %27 = arith.addf %20, %26 : vector<1x64xf32>
    %c3 = arith.constant 3 : index
    %c0_15 = arith.constant 0 : index
    %c0_16 = arith.constant 0 : index
    %28 = vector.load %arg4[%c3, %c0_15, %c0_16] : memref<9x256x64xbf16, #tpu.memory_space<vmem>>, vector<1x256x64xbf16>
    %29 = vector.shape_cast %28 : vector<1x256x64xbf16> to vector<256x64xbf16>
    %30 = arith.extf %29 : vector<256x64xbf16> to vector<256x64xf32>
    %31 = vector.extract_strided_slice %5 {offsets = [0, 3, 0], sizes = [1, 1, 256], strides = [1, 1, 1]} : vector<1x9x256xf32> to vector<1x1x256xf32>
    %32 = vector.shape_cast %31 : vector<1x1x256xf32> to vector<1x256xf32>
    %cst_17 = arith.constant dense<0.000000e+00> : vector<1x64xf32>
    %33 = tpu.matmul %32, %30, %cst_17 {dimension_numbers = #tpu.dot_dimension_numbers<[1], [0], [0], [1], [0, 0, 1, 1], [], []>} : vector<1x256xf32>, vector<256x64xf32>, vector<1x64xf32> -> vector<1x64xf32>
    %34 = arith.addf %27, %33 : vector<1x64xf32>
    %c4 = arith.constant 4 : index
    %c0_18 = arith.constant 0 : index
    %c0_19 = arith.constant 0 : index
    %35 = vector.load %arg4[%c4, %c0_18, %c0_19] : memref<9x256x64xbf16, #tpu.memory_space<vmem>>, vector<1x256x64xbf16>
    %36 = vector.shape_cast %35 : vector<1x256x64xbf16> to vector<256x64xbf16>
    %37 = arith.extf %36 : vector<256x64xbf16> to vector<256x64xf32>
    %38 = vector.extract_strided_slice %5 {offsets = [0, 4, 0], sizes = [1, 1, 256], strides = [1, 1, 1]} : vector<1x9x256xf32> to vector<1x1x256xf32>
    %39 = vector.shape_cast %38 : vector<1x1x256xf32> to vector<1x256xf32>
    %cst_20 = arith.constant dense<0.000000e+00> : vector<1x64xf32>
    %40 = tpu.matmul %39, %37, %cst_20 {dimension_numbers = #tpu.dot_dimension_numbers<[1], [0], [0], [1], [0, 0, 1, 1], [], []>} : vector<1x256xf32>, vector<256x64xf32>, vector<1x64xf32> -> vector<1x64xf32>
    %41 = arith.addf %34, %40 : vector<1x64xf32>
    %c5 = arith.constant 5 : index
    %c0_21 = arith.constant 0 : index
    %c0_22 = arith.constant 0 : index
    %42 = vector.load %arg4[%c5, %c0_21, %c0_22] : memref<9x256x64xbf16, #tpu.memory_space<vmem>>, vector<1x256x64xbf16>
    %43 = vector.shape_cast %42 : vector<1x256x64xbf16> to vector<256x64xbf16>
    %44 = arith.extf %43 : vector<256x64xbf16> to vector<256x64xf32>
    %45 = vector.extract_strided_slice %5 {offsets = [0, 5, 0], sizes = [1, 1, 256], strides = [1, 1, 1]} : vector<1x9x256xf32> to vector<1x1x256xf32>
    %46 = vector.shape_cast %45 : vector<1x1x256xf32> to vector<1x256xf32>
    %cst_23 = arith.constant dense<0.000000e+00> : vector<1x64xf32>
    %47 = tpu.matmul %46, %44, %cst_23 {dimension_numbers = #tpu.dot_dimension_numbers<[1], [0], [0], [1], [0, 0, 1, 1], [], []>} : vector<1x256xf32>, vector<256x64xf32>, vector<1x64xf32> -> vector<1x64xf32>
    %48 = arith.addf %41, %47 : vector<1x64xf32>
    %c6 = arith.constant 6 : index
    %c0_24 = arith.constant 0 : index
    %c0_25 = arith.constant 0 : index
    %49 = vector.load %arg4[%c6, %c0_24, %c0_25] : memref<9x256x64xbf16, #tpu.memory_space<vmem>>, vector<1x256x64xbf16>
    %50 = vector.shape_cast %49 : vector<1x256x64xbf16> to vector<256x64xbf16>
    %51 = arith.extf %50 : vector<256x64xbf16> to vector<256x64xf32>
    %52 = vector.extract_strided_slice %5 {offsets = [0, 6, 0], sizes = [1, 1, 256], strides = [1, 1, 1]} : vector<1x9x256xf32> to vector<1x1x256xf32>
    %53 = vector.shape_cast %52 : vector<1x1x256xf32> to vector<1x256xf32>
    %cst_26 = arith.constant dense<0.000000e+00> : vector<1x64xf32>
    %54 = tpu.matmul %53, %51, %cst_26 {dimension_numbers = #tpu.dot_dimension_numbers<[1], [0], [0], [1], [0, 0, 1, 1], [], []>} : vector<1x256xf32>, vector<256x64xf32>, vector<1x64xf32> -> vector<1x64xf32>
    %55 = arith.addf %48, %54 : vector<1x64xf32>
    %c7 = arith.constant 7 : index
    %c0_27 = arith.constant 0 : index
    %c0_28 = arith.constant 0 : index
    %56 = vector.load %arg4[%c7, %c0_27, %c0_28] : memref<9x256x64xbf16, #tpu.memory_space<vmem>>, vector<1x256x64xbf16>
    %57 = vector.shape_cast %56 : vector<1x256x64xbf16> to vector<256x64xbf16>
    %58 = arith.extf %57 : vector<256x64xbf16> to vector<256x64xf32>
    %59 = vector.extract_strided_slice %5 {offsets = [0, 7, 0], sizes = [1, 1, 256], strides = [1, 1, 1]} : vector<1x9x256xf32> to vector<1x1x256xf32>
    %60 = vector.shape_cast %59 : vector<1x1x256xf32> to vector<1x256xf32>
    %cst_29 = arith.constant dense<0.000000e+00> : vector<1x64xf32>
    %61 = tpu.matmul %60, %58, %cst_29 {dimension_numbers = #tpu.dot_dimension_numbers<[1], [0], [0], [1], [0, 0, 1, 1], [], []>} : vector<1x256xf32>, vector<256x64xf32>, vector<1x64xf32> -> vector<1x64xf32>
    %62 = arith.addf %55, %61 : vector<1x64xf32>
    %c8 = arith.constant 8 : index
    %c0_30 = arith.constant 0 : index
    %c0_31 = arith.constant 0 : index
    %63 = vector.load %arg4[%c8, %c0_30, %c0_31] : memref<9x256x64xbf16, #tpu.memory_space<vmem>>, vector<1x256x64xbf16>
    %64 = vector.shape_cast %63 : vector<1x256x64xbf16> to vector<256x64xbf16>
    %65 = arith.extf %64 : vector<256x64xbf16> to vector<256x64xf32>
    %66 = vector.extract_strided_slice %5 {offsets = [0, 8, 0], sizes = [1, 1, 256], strides = [1, 1, 1]} : vector<1x9x256xf32> to vector<1x1x256xf32>
    %67 = vector.shape_cast %66 : vector<1x1x256xf32> to vector<1x256xf32>
    %cst_32 = arith.constant dense<0.000000e+00> : vector<1x64xf32>
    %68 = tpu.matmul %67, %65, %cst_32 {dimension_numbers = #tpu.dot_dimension_numbers<[1], [0], [0], [1], [0, 0, 1, 1], [], []>} : vector<1x256xf32>, vector<256x64xf32>, vector<1x64xf32> -> vector<1x64xf32>
    %69 = arith.addf %62, %68 : vector<1x64xf32>
    %c0_33 = arith.constant 0 : index
    %70 = memref.load %arg1[%c0_33] : memref<2xf32, #tpu.memory_space<smem>>
    %71 = vector.broadcast %70 : f32 to vector<1x64xf32>
    %72 = arith.addf %69, %71 : vector<1x64xf32>
    %cst_34 = arith.constant 0.000000e+00 : f32
    %73 = vector.broadcast %cst_34 : f32 to vector<1x64xf32>
    %74 = arith.maximumf %72, %73 : vector<1x64xf32>
    %c0_35 = arith.constant 0 : index
    %c0_36 = arith.constant 0 : index
    %75 = vector.load %arg5[%c0_35, %c0_36] : memref<64x256xf32, #tpu.memory_space<vmem>>, vector<64x256xf32>
    %cst_37 = arith.constant dense<0.000000e+00> : vector<1x256xf32>
    %76 = tpu.matmul %74, %75, %cst_37 {dimension_numbers = #tpu.dot_dimension_numbers<[1], [0], [0], [1], [0, 0, 1, 1], [], []>} : vector<1x64xf32>, vector<64x256xf32>, vector<1x256xf32> -> vector<1x256xf32>
    %c1_38 = arith.constant 1 : index
    %77 = memref.load %arg1[%c1_38] : memref<2xf32, #tpu.memory_space<smem>>
    %78 = vector.broadcast %77 : f32 to vector<1x256xf32>
    %79 = arith.addf %76, %78 : vector<1x256xf32>
    %80 = arith.negf %79 : vector<1x256xf32>
    %81 = math.exp %80 : vector<1x256xf32>
    %cst_39 = arith.constant 1.000000e+00 : f32
    %82 = vector.broadcast %cst_39 : f32 to vector<1x256xf32>
    %83 = arith.addf %82, %81 : vector<1x256xf32>
    %84 = arith.divf %82, %83 : vector<1x256xf32>
    %c0_40 = arith.constant 0 : index
    %c0_41 = arith.constant 0 : index
    %c0_42 = arith.constant 0 : index
    %85 = vector.load %arg6[%c0_40, %c0_41, %c0_42] : memref<1x1x256xf32, #tpu.memory_space<vmem>>, vector<1x1x256xf32>
    %86 = vector.shape_cast %85 : vector<1x1x256xf32> to vector<1x256xf32>
    %87 = vector.shape_cast %84 : vector<1x256xf32> to vector<1x1x256xf32>
    tpu.vector_store %arg6[%c0_40, %c0_41, %c0_42], %87 {strides = array<i32>} : memref<1x1x256xf32, #tpu.memory_space<vmem>>, vector<1x1x256xf32>,
    return
  }
  func.func @transform_0(%arg0: i32) -> i32 {
    %c0_i32 = arith.constant 0 : i32
    %c0_i32_0 = arith.constant 0 : i32
    return %c0_i32 : i32
  }
  func.func @transform_1(%arg0: i32) -> (i32, i32, i32) {
    %c0_i32 = arith.constant 0 : i32
    %c0_i32_0 = arith.constant 0 : i32
    %c0_i32_1 = arith.constant 0 : i32
    return %arg0, %c0_i32, %c0_i32_0 : i32, i32, i32
  }
  func.func @transform_2(%arg0: i32) -> (i32, i32) {
    %c0_i32 = arith.constant 0 : i32
    %c0_i32_0 = arith.constant 0 : i32
    %c0_i32_1 = arith.constant 0 : i32
    return %c0_i32, %c0_i32_0 : i32, i32
  }
  func.func @transform_3(%arg0: i32) -> (i32, i32, i32) {
    %c0_i32 = arith.constant 0 : i32
    %c0_i32_0 = arith.constant 0 : i32
    %c0_i32_1 = arith.constant 0 : i32
    %c0_i32_2 = arith.constant 0 : i32
    return %c0_i32, %c0_i32_0, %c0_i32_1 : i32, i32, i32
  }
  func.func @transform_4(%arg0: i32) -> (i32, i32) {
    %c0_i32 = arith.constant 0 : i32
    %c0_i32_0 = arith.constant 0 : i32
    %c0_i32_1 = arith.constant 0 : i32
    return %c0_i32, %c0_i32_0 : i32, i32
  }
  func.func @transform_5(%arg0: i32) -> (i32, i32, i32) {
    %c0_i32 = arith.constant 0 : i32
    %c0_i32_0 = arith.constant 0 : i32
    %c0_i32_1 = arith.constant 0 : i32
    return %arg0, %c0_i32, %c0_i32_0 : i32, i32, i32
  }
}

</mosaic_0001>

<bundles_post_ra>
// kernel: spatial_attn_forward.1
= control target key start
LH: loop header
LB: loop body
LE: loop exit
PB: predicated region body
PF: predicated region fallthrough
CT: control target
= control target key end

     0   :  { %10 = vsyncpa [#allocation3], 0  ;;  %s3541_s18 = smov 0   ;;  %s4154_s0 = inlined_call_operand.vmem [shape: f32[2], index: 0, kind: input, shape index: {}]   ;;  %s4155_s1 = inlined_call_operand.vmem [shape: f32[2,256,256], index: 1, kind: input, shape index: {}]   ;;  %s4156_s2 = inlined_call_operand.vmem [shape: bf16[9,256], index: 2, kind: input, shape index: {}]   ;;  %s4157_s3 = inlined_call_operand.vmem [shape: bf16[9,256,64], index: 3, kind: input, shape index: {}]   ;;  %s4158_s4 = inlined_call_operand.vmem [shape: f32[64,256], index: 4, kind: input, shape index: {}]   ;;  %s4159_s5 = inlined_call_operand.vmem [shape: f32[2,1,256], index: 5, kind: output, shape index: {}]  }
   0x1 LB: > { %s1836_s19 = sadd.s32 4294967295, %s3506_s18   ;;  %p1838_p0 = scmp.ge.s32.totalorder %s3506_s18, 1  ;;  %s3506_s18 = sphi %s3541_s18, %s16_s18  }
   0x2   : > { %p157_p1 = scmp.lt.s32.totalorder %s3506_s18, 3  ;;  %s170_s22 = sshll.u32 %s4154_s0, 4  ;;  %s171_s22 = int_to_ptr.vmem [resolvable:$true] %s170_s22 }
   0x3   : > { %p3457_p3 = scmp.eq.s32.totalorder %s1836_s19, 0  ;;  %s3481_s24 = scalar_lea.vmem %s171_s22, 16 }
   0x4   : > { %p3552_p2 = pnand %p1838_p0, %p157_p1  ;;  %p3482_p6 = scmp.ne.s32.totalorder %s171_s22, %s3481_s24 }
   0x5   : > { %p3489_p10 = scmp.lt.s32.totalorder %s171_s22, %s171_s22  ;;  %p3490_p11 = scmp.lt.s32.totalorder %s3481_s24, %s3481_s24 }
   0x6   : > { %p3453_p4 = pneg %p3552_p2 }
   0x7   : > { %p3491_p12 = por %p3490_p11, %p3489_p10 }
   0x8   : > { %p3454_p5 = pnand %p3457_p3, %p3453_p4 }
   0xa   : > { %p3483_p7 = pneg %p3454_p5 }
   0xc   : > { %p3484_p8 = pnand %p3483_p7, %p3482_p6 }
   0xe   : > { %p3485_p9 = pneg %p3484_p8 }
  0x10   : > { %p3492_p13 = pnand %p3491_p12, %p3485_p9 }
  0x12   : > { %3495 = shalt.err (!%p3492_p13)
}
  0x13   : > { %s3508_s25 = smov [#allocation2]   ;;  %200 = sbr.rel (%p3552_p2) target bundleno = 916 (0x394), region = 40 }
  0x14   : > { %3456 = dma.vmem_to_smem (!%p3454_p5), %s171_s22, 16, %s3508_s25, [#allocation3]  }
  0x1a   : > { %3501 = dma.done.wait (%p3457_p3), [#allocation3], 16  }
  0x1b   : > { %3503 = vsyncadd (%p3457_p3), [#allocation3], 4294967280 }
  0x1c   : > { %206 = sfence }
  0x1d   : > { %p228_p0 = scmp.lt.s32.totalorder %s1836_s19, 1  ;;  %v2710_v0 = vld [vmem:[%s4157_s3 + $0xc0] sm:$0xff]   ;;  %v2711_v3 = vld [vmem:[%s4157_s3 + $0xc8] sm:$0xff]   ;;  %v2712_v5 = vld [vmem:[%s4157_s3 + $0xd0] sm:$0xff]   ;;  %s1639_s7 = sld [smem:[#allocation2]]  ;;  %vm1661_vm0 = vcmask 523264  }
  0x1e   : > { %v3472_v1 = vld [vmem:[%s4156_s2 + $0x4] ss:$8 sps:$4 sm:$0x1f]   ;;  %3146 = vmatprep.subr.bf16.mxu1 %v2710_v0  ;;  %v2704_v9 = vld [vmem:[%s4157_s3 + $0x90] sm:$0xff]   ;;  %v2713_v20 = vld [vmem:[%s4157_s3 + $0xd8] sm:$0xff]   ;;  %s2104_s8 = sld [smem:[#allocation2 + $0x1]] }
  0x1f   : > { %s4162_s19 = smov (!%p228_p0, %s1836_s19), 1  ;;  %v2702_v2 = vld [vmem:[%s4157_s3 + $0x80] sm:$0xff]   ;;  %377 = vmatprep.mubr.bf16.mxu0 %v3472_v1  ;;  %v2703_v4 = vld [vmem:[%s4157_s3 + $0x88] sm:$0xff]   ;;  %v2705_v49 = vld [vmem:[%s4157_s3 + $0x98] sm:$0xff]  }
  0x20   : > { %3148 = vmatpush3.bf16.msra.mxu1 %v2702_v2  ;;  %s2110_s9 = sshll.u32 %s4162_s19, 9  ;;  %v2714_v52 = vld [vmem:[%s4157_s3 + $0xe0] sm:$0xff]   ;;  %v2715_v55 = vld [vmem:[%s4157_s3 + $0xe8] sm:$0xff]   ;;  %v2716_v63 = vld [vmem:[%s4157_s3 + $0xf0] sm:$0xff]  }
  0x21   : > { %3150 = vmatprep.subr.bf16.mxu1 %v2711_v3  ;;  %s3584_s14 = scalar_lea.vmem %s4155_s1, %s2110_s9  ;;  %v2706_v53 = vld [vmem:[%s4157_s3 + $0xa0] sm:$0xff]   ;;  %v2707_v61 = vld [vmem:[%s4157_s3 + $0xa8] sm:$0xff]   ;;  %s1845_s9 = sshll.u32 %s4162_s19, 1 }
  0x22   : > { %v240_v6 = vld [vmem:[%s3584_s14 + $0x8] sm:$0xff]  ;;  %v242_v7 = vld [vmem:[%s3584_s14 + $0x18] sm:$0xff]  ;;  %v239_v8 = vld [vmem:[%s3584_s14] sm:$0xff]  ;;  %s236_s12 = scalar_lea.vmem %s4159_s5, %s1845_s9 }
  0x23   : > { %v304_v10 = vpack.c.bf16 %v242_v7, %v240_v6  ;;  %v241_v11 = vld [vmem:[%s3584_s14 + $0x10] sm:$0xff]  ;;  %v244_v12 = vld [vmem:[%s3584_s14 + $0x28] sm:$0xff]  ;;  %v246_v13 = vld [vmem:[%s3584_s14 + $0x38] sm:$0xff] }
  0x24   : > { %3152 = vmatpush3.bf16.msra.mxu1 %v2703_v4  ;;  %v303_v14 = vpack.c.bf16 %v241_v11, %v239_v8  ;;  %v306_v15 = vpack.c.bf16 %v246_v13, %v244_v12  ;;  %v243_v16 = vld [vmem:[%s3584_s14 + $0x20] sm:$0xff]  ;;  %v245_v17 = vld [vmem:[%s3584_s14 + $0x30] sm:$0xff]  ;;  %v248_v18 = vld [vmem:[%s3584_s14 + $0x48] sm:$0xff] }
  0x25   : > { %3154 = vmatprep.subr.bf16.mxu1 %v2712_v5  ;;  %345 = vmatprep.subr.bf16.mxu0 %v304_v10  ;;  %v250_v19 = vld [vmem:[%s3584_s14 + $0x58] sm:$0xff]  ;;  %v305_v21 = vpack.c.bf16 %v245_v17, %v243_v16  ;;  %v247_v23 = vld [vmem:[%s3584_s14 + $0x40] sm:$0xff]  ;;  %v249_v24 = vld [vmem:[%s3584_s14 + $0x50] sm:$0xff] }
  0x26   : > { %346 = vmatpush1.bf16.msra.mxu0 %v303_v14  ;;  %v308_v22 = vpack.c.bf16 %v250_v19, %v248_v18  ;;  %v252_v25 = vld [vmem:[%s3584_s14 + $0x68] sm:$0xff]  ;;  %v254_v26 = vld [vmem:[%s3584_s14 + $0x78] sm:$0xff]  ;;  %v307_v27 = vpack.c.bf16 %v249_v24, %v247_v23  ;;  %v251_v29 = vld [vmem:[%s3584_s14 + $0x60] sm:$0xff] }
  0x27   : > { %347 = vmatprep.subr.bf16.mxu0 %v306_v15  ;;  %v310_v28 = vpack.c.bf16 %v254_v26, %v252_v25  ;;  %v253_v30 = vld [vmem:[%s3584_s14 + $0x70] sm:$0xff]  ;;  %v256_v31 = vld [vmem:[%s3584_s14 + $0x88] sm:$0xff]  ;;  %v258_v32 = vld [vmem:[%s3584_s14 + $0x98] sm:$0xff] }
  0x28   : > { %3156 = vmatpush3.bf16.msra.mxu1 %v2704_v9  ;;  %v309_v33 = vpack.c.bf16 %v253_v30, %v251_v29  ;;  %v312_v34 = vpack.c.bf16 %v258_v32, %v256_v31  ;;  %v255_v35 = vld [vmem:[%s3584_s14 + $0x80] sm:$0xff]  ;;  %v257_v36 = vld [vmem:[%s3584_s14 + $0x90] sm:$0xff]  ;;  %v260_v37 = vld [vmem:[%s3584_s14 + $0xa8] sm:$0xff] }
  0x29   : > { %3158 = vmatprep.subr.bf16.mxu1 %v2713_v20  ;;  %v262_v38 = vld [vmem:[%s3584_s14 + $0xb8] sm:$0xff]  ;;  %v311_v39 = vpack.c.bf16 %v257_v36, %v255_v35  ;;  %v259_v41 = vld [vmem:[%s3584_s14 + $0xa0] sm:$0xff]  ;;  %v261_v42 = vld [vmem:[%s3584_s14 + $0xb0] sm:$0xff] }
  0x2a   : > { %348 = vmatpush1.bf16.msra.mxu0 %v305_v21  ;;  %v314_v40 = vpack.c.bf16 %v262_v38, %v260_v37  ;;  %v264_v43 = vld [vmem:[%s3584_s14 + $0xc8] sm:$0xff]  ;;  %v266_v44 = vld [vmem:[%s3584_s14 + $0xd8] sm:$0xff]  ;;  %v313_v45 = vpack.c.bf16 %v261_v42, %v259_v41  ;;  %v263_v47 = vld [vmem:[%s3584_s14 + $0xc0] sm:$0xff] }
  0x2b   : > { %349 = vmatprep.subr.bf16.mxu0 %v308_v22  ;;  %v316_v46 = vpack.c.bf16 %v266_v44, %v264_v43  ;;  %v265_v48 = vld [vmem:[%s3584_s14 + $0xd0] sm:$0xff]  ;;  %v268_v50 = vld [vmem:[%s3584_s14 + $0xe8] sm:$0xff]  ;;  %v270_v51 = vld [vmem:[%s3584_s14 + $0xf8] sm:$0xff] }
  0x2c   : > { %3160 = vmatpush3.bf16.msra.mxu1 %v2705_v49  ;;  %v315_v54 = vpack.c.bf16 %v265_v48, %v263_v47  ;;  %v318_v56 = vpack.c.bf16 %v270_v51, %v268_v50  ;;  %v267_v57 = vld [vmem:[%s3584_s14 + $0xe0] sm:$0xff]  ;;  %v269_v58 = vld [vmem:[%s3584_s14 + $0xf0] sm:$0xff]  ;;  %v272_v59 = vld [vmem:[%s3584_s14 + $0x108] sm:$0xff] }
  0x2d   : > { %3162 = vmatprep.subr.bf16.mxu1 %v2714_v52  ;;  %v274_v60 = vld [vmem:[%s3584_s14 + $0x118] sm:$0xff]  ;;  %v317_v62 = vpack.c.bf16 %v269_v58, %v267_v57  ;;  %v271_v1 = vld [vmem:[%s3584_s14 + $0x100] sm:$0xff]  ;;  %v273_v2 = vld [vmem:[%s3584_s14 + $0x110] sm:$0xff] }
  0x2e   : > { %350 = vmatpush1.bf16.msra.mxu0 %v307_v27  ;;  %v320_v0 = vpack.c.bf16 %v274_v60, %v272_v59  ;;  %v276_v3 = vld [vmem:[%s3584_s14 + $0x128] sm:$0xff]  ;;  %v278_v4 = vld [vmem:[%s3584_s14 + $0x138] sm:$0xff]  ;;  %v2708_v5 = vld [vmem:[%s4157_s3 + $0xb0] sm:$0xff]   ;;  %v319_v6 = vpack.c.bf16 %v273_v2, %v271_v1 }
  0x2f   : > { %351 = vmatprep.subr.bf16.mxu0 %v310_v28  ;;  %v322_v7 = vpack.c.bf16 %v278_v4, %v276_v3  ;;  %v275_v8 = vld [vmem:[%s3584_s14 + $0x120] sm:$0xff]  ;;  %v277_v9 = vld [vmem:[%s3584_s14 + $0x130] sm:$0xff]  ;;  %v280_v10 = vld [vmem:[%s3584_s14 + $0x148] sm:$0xff] }
  0x30   : > { %3164 = vmatpush3.bf16.msra.mxu1 %v2706_v53  ;;  %v282_v11 = vld [vmem:[%s3584_s14 + $0x158] sm:$0xff]  ;;  %v321_v12 = vpack.c.bf16 %v277_v9, %v275_v8  ;;  %v279_v14 = vld [vmem:[%s3584_s14 + $0x140] sm:$0xff]  ;;  %v281_v15 = vld [vmem:[%s3584_s14 + $0x150] sm:$0xff] }
  0x31   : > { %3166 = vmatprep.subr.bf16.mxu1 %v2715_v55  ;;  %v324_v13 = vpack.c.bf16 %v282_v11, %v280_v10  ;;  %v284_v16 = vld [vmem:[%s3584_s14 + $0x168] sm:$0xff]  ;;  %v286_v17 = vld [vmem:[%s3584_s14 + $0x178] sm:$0xff]  ;;  %v323_v18 = vpack.c.bf16 %v281_v15, %v279_v14  ;;  %v283_v20 = vld [vmem:[%s3584_s14 + $0x160] sm:$0xff] }
  0x32   : > { %352 = vmatpush1.bf16.msra.mxu0 %v309_v33  ;;  %v326_v19 = vpack.c.bf16 %v286_v17, %v284_v16  ;;  %v285_v21 = vld [vmem:[%s3584_s14 + $0x170] sm:$0xff]  ;;  %v288_v22 = vld [vmem:[%s3584_s14 + $0x188] sm:$0xff]  ;;  %v290_v23 = vld [vmem:[%s3584_s14 + $0x198] sm:$0xff] }
  0x33   : > { %353 = vmatprep.subr.bf16.mxu0 %v312_v34  ;;  %v325_v24 = vpack.c.bf16 %v285_v21, %v283_v20  ;;  %v328_v25 = vpack.c.bf16 %v290_v23, %v288_v22  ;;  %v287_v26 = vld [vmem:[%s3584_s14 + $0x180] sm:$0xff]  ;;  %v289_v27 = vld [vmem:[%s3584_s14 + $0x190] sm:$0xff]  ;;  %v292_v28 = vld [vmem:[%s3584_s14 + $0x1a8] sm:$0xff] }
  0x34   : > { %3168 = vmatpush3.bf16.msra.mxu1 %v2707_v61  ;;  %v294_v29 = vld [vmem:[%s3584_s14 + $0x1b8] sm:$0xff]  ;;  %v327_v30 = vpack.c.bf16 %v289_v27, %v287_v26  ;;  %v291_v32 = vld [vmem:[%s3584_s14 + $0x1a0] sm:$0xff]  ;;  %v293_v33 = vld [vmem:[%s3584_s14 + $0x1b0] sm:$0xff] }
  0x35   : > { %3170 = vmatprep.subr.bf16.mxu1 %v2716_v63  ;;  %v330_v31 = vpack.c.bf16 %v294_v29, %v292_v28  ;;  %v296_v34 = vld [vmem:[%s3584_s14 + $0x1c8] sm:$0xff]  ;;  %v298_v35 = vld [vmem:[%s3584_s14 + $0x1d8] sm:$0xff]  ;;  %v329_v36 = vpack.c.bf16 %v293_v33, %v291_v32  ;;  %v295_v38 = vld [vmem:[%s3584_s14 + $0x1c0] sm:$0xff] }
  0x36   : > { %354 = vmatpush1.bf16.msra.mxu0 %v311_v39  ;;  %v332_v37 = vpack.c.bf16 %v298_v35, %v296_v34  ;;  %v297_v39 = vld [vmem:[%s3584_s14 + $0x1d0] sm:$0xff]  ;;  %v302_v41 = vld [vmem:[%s3584_s14 + $0x1f8] sm:$0xff]  ;;  %v299_v44 = vld [vmem:[%s3584_s14 + $0x1e0] sm:$0xff] }
  0x37   : > { %355 = vmatprep.subr.bf16.mxu0 %v314_v40  ;;  %v300_v40 = vld [vmem:[%s3584_s14 + $0x1e8] sm:$0xff]  ;;  %v331_v42 = vpack.c.bf16 %v297_v39, %v295_v38  ;;  %v2726_v47 = vld [vmem:[%s4157_s3 + $0x140] sm:$0xff]   ;;  %v2728_v52 = vld [vmem:[%s4157_s3 + $0x150] sm:$0xff]  }
  0x38   : > { %3172 = vmatpush3.bf16.msra.mxu1 %v2708_v5  ;;  %v334_v43 = vpack.c.bf16 %v302_v41, %v300_v40  ;;  %v3470_v48 = vld [vmem:[%s4156_s2] ss:$8 sps:$4 sm:$0x1f]   ;;  %v2720_v53 = vld [vmem:[%s4157_s3 + $0x110] sm:$0xff]   ;;  %v2721_v55 = vld [vmem:[%s4157_s3 + $0x118] sm:$0xff]  }
  0x39   : > { %v2718_v49 = vld [vmem:[%s4157_s3 + $0x100] sm:$0xff]   ;;  %v2727_v50 = vld [vmem:[%s4157_s3 + $0x148] sm:$0xff]   ;;  %v2732_v60 = vld [vmem:[%s4157_s3 + $0x170] sm:$0xff]  }
  0x3a   : > { %356 = vmatpush1.bf16.msra.mxu0 %v313_v45  ;;  %v301_v45 = vld [vmem:[%s3584_s14 + $0x1f0] sm:$0xff]  ;;  %v2719_v51 = vld [vmem:[%s4157_s3 + $0x108] sm:$0xff]   ;;  %v2722_v57 = vld [vmem:[%s4157_s3 + $0x120] sm:$0xff]  }
  0x3b   : > { %357 = vmatprep.subr.bf16.mxu0 %v316_v46  ;;  %v333_v46 = vpack.c.bf16 %v301_v45, %v299_v44  ;;  %v2731_v58 = vld [vmem:[%s4157_s3 + $0x168] sm:$0xff]   ;;  %v2724_v61 = vld [vmem:[%s4157_s3 + $0x130] sm:$0xff]   ;;  %v2733_v63 = vld [vmem:[%s4157_s3 + $0x178] sm:$0xff]  }
  0x3c   : > { %v2723_v59 = vld [vmem:[%s4157_s3 + $0x128] sm:$0xff]   ;;  %v2725_v1 = vld [vmem:[%s4157_s3 + $0x138] sm:$0xff]   ;;  %v2694_v2 = vld [vmem:[%s4157_s3 + $0x40] sm:$0xff]  }
  0x3d   : > { %v2758_v3 = vld [vmem:[%s4157_s3 + $0x240] sm:$0xff]   ;;  %v2695_v15 = vld [vmem:[%s4157_s3 + $0x48] sm:$0xff]   ;;  %v2760_v20 = vld [vmem:[%s4157_s3 + $0x250] sm:$0xff]  }
  0x3e   : > { %358 = vmatpush1.bf16.msra.mxu0 %v315_v54  ;;  %v2729_v54 = vld [vmem:[%s4157_s3 + $0x158] sm:$0xff]   ;;  %v2112_v11 = vld [vmem:[%s4157_s3] sm:$0xff]   ;;  %v2759_v16 = vld [vmem:[%s4157_s3 + $0x248] sm:$0xff]  }
  0x3f   : > { %359 = vmatprep.subr.bf16.mxu0 %v318_v56  ;;  %v2730_v56 = vld [vmem:[%s4157_s3 + $0x160] sm:$0xff]   ;;  %v2687_v17 = vld [vmem:[%s4157_s3 + $0x8] sm:$0xff]   ;;  %v2688_v21 = vld [vmem:[%s4157_s3 + $0x10] sm:$0xff]  }
  0x40   : > { %v2752_v22 = vld [vmem:[%s4157_s3 + $0x210] sm:$0xff]   ;;  %v2697_v23 = vld [vmem:[%s4157_s3 + $0x58] sm:$0xff]   ;;  %v2698_v27 = vld [vmem:[%s4157_s3 + $0x60] sm:$0xff]  }
  0x41   : > { %v2753_v26 = vld [vmem:[%s4157_s3 + $0x218] sm:$0xff]   ;;  %v2762_v28 = vld [vmem:[%s4157_s3 + $0x260] sm:$0xff]   ;;  %v2763_v32 = vld [vmem:[%s4157_s3 + $0x268] sm:$0xff]  }
  0x42   : > { %360 = vmatpush1.bf16.msra.mxu0 %v317_v62  ;;  %v2717_v62 = vld [vmem:[%s4157_s3 + $0xf8] sm:$0xff]   ;;  %v2690_v29 = vld [vmem:[%s4157_s3 + $0x20] sm:$0xff]   ;;  %v2691_v33 = vld [vmem:[%s4157_s3 + $0x28] sm:$0xff]  }
  0x43   : > { %361 = vmatprep.subr.bf16.mxu0 %v320_v0  ;;  %3174 = vmatprep.subr.bf16.mxu1 %v2717_v62  ;;  %v2709_v0 = vld [vmem:[%s4157_s3 + $0xb8] sm:$0xff]   ;;  %v2755_v34 = vld [vmem:[%s4157_s3 + $0x228] sm:$0xff]   ;;  %v2700_v35 = vld [vmem:[%s4157_s3 + $0x70] sm:$0xff]  }
  0x44   : > { %3176 = vmatpush3.bf16.msra.mxu1 %v2709_v0  ;;  %v2756_v38 = vld [vmem:[%s4157_s3 + $0x230] sm:$0xff]   ;;  %v2701_v39 = vld [vmem:[%s4157_s3 + $0x78] sm:$0xff]   ;;  %v2790_v44 = vld [vmem:[%s4157_s3 + $0x340] sm:$0xff]  }
  0x45   : > { %3178 = vmatprep.subr.bf16.mxu1 %v2694_v2  ;;  %v2765_v40 = vld [vmem:[%s4157_s3 + $0x278] sm:$0xff]   ;;  %v2746_v62 = vld [vmem:[%s4157_s3 + $0x1e0] sm:$0xff]   ;;  %v2747_v2 = vld [vmem:[%s4157_s3 + $0x1e8] sm:$0xff]  }
  0x46   : > { %362 = vmatpush1.bf16.msra.mxu0 %v319_v6  ;;  %v2693_v41 = vld [vmem:[%s4157_s3 + $0x38] sm:$0xff]   ;;  %v2738_v0 = vld [vmem:[%s4157_s3 + $0x1a0] sm:$0xff]  }
  0x47   : > { %363 = vmatprep.subr.bf16.mxu0 %v322_v7 }
  0x4a   : > { %364 = vmatpush1.bf16.msra.mxu0 %v321_v12 }
  0x4b   : > { %365 = vmatprep.subr.bf16.mxu0 %v324_v13  ;;  %v2750_v13 = vld [vmem:[%s4157_s3 + $0x200] sm:$0xff]  }
  0x4e   : > { %366 = vmatpush1.bf16.msra.mxu0 %v323_v18  ;;  %v2751_v18 = vld [vmem:[%s4157_s3 + $0x208] sm:$0xff]  }
  0x4f   : > { %367 = vmatprep.subr.bf16.mxu0 %v326_v19  ;;  %v2696_v19 = vld [vmem:[%s4157_s3 + $0x50] sm:$0xff]  }
  0x52   : > { %368 = vmatpush1.bf16.msra.mxu0 %v325_v24  ;;  %v2761_v24 = vld [vmem:[%s4157_s3 + $0x258] sm:$0xff]  }
  0x53   : > { %369 = vmatprep.subr.bf16.mxu0 %v328_v25  ;;  %v2689_v25 = vld [vmem:[%s4157_s3 + $0x18] sm:$0xff]  }
  0x56   : > { %370 = vmatpush1.bf16.msra.mxu0 %v327_v30  ;;  %v2754_v30 = vld [vmem:[%s4157_s3 + $0x220] sm:$0xff]  }
  0x57   : > { %371 = vmatprep.subr.bf16.mxu0 %v330_v31  ;;  %v2699_v31 = vld [vmem:[%s4157_s3 + $0x68] sm:$0xff]  }
  0x5a   : > { %372 = vmatpush1.bf16.msra.mxu0 %v329_v36  ;;  %v2764_v36 = vld [vmem:[%s4157_s3 + $0x270] sm:$0xff]  }
  0x5b   : > { %373 = vmatprep.subr.bf16.mxu0 %v332_v37  ;;  %v2692_v37 = vld [vmem:[%s4157_s3 + $0x30] sm:$0xff]  }
  0x5e   : > { %374 = vmatpush1.bf16.msra.mxu0 %v331_v42  ;;  %v2757_v42 = vld [vmem:[%s4157_s3 + $0x238] sm:$0xff]  }
  0x5f   : > { %375 = vmatprep.subr.bf16.mxu0 %v334_v43  ;;  %v2742_v43 = vld [vmem:[%s4157_s3 + $0x1c0] sm:$0xff]  }
  0x62   : > { %376 = vmatpush1.bf16.msra.mxu0 %v333_v46  ;;  %v2734_v46 = vld [vmem:[%s4157_s3 + $0x180] sm:$0xff]  }
  0x63   : > { %3210 = vmatprep.subr.bf16.mxu0 %v2726_v47 }
  0x65   : > { %378 = vmatmul.mubr.bf16.vlgmr.msra.gmra.mrb[0].mxu0 %v3470_v48  ;;  %v2782_v48 = vld [vmem:[%s4157_s3 + $0x300] sm:$0xff]  }
  0x66   : > { %3212 = vmatpush3.bf16.msra.mxu0 %v2718_v49 }
  0x67   : > { %3214 = vmatprep.subr.bf16.mxu0 %v2727_v50  ;;  %v2743_v50 = vld [vmem:[%s4157_s3 + $0x1c8] sm:$0xff]  }
  0x6a   : > { %3216 = vmatpush3.bf16.msra.mxu0 %v2719_v51  ;;  %v2791_v51 = vld [vmem:[%s4157_s3 + $0x348] sm:$0xff]  }
  0x6b   : > { %3218 = vmatprep.subr.bf16.mxu0 %v2728_v52  ;;  %v2735_v52 = vld [vmem:[%s4157_s3 + $0x188] sm:$0xff]  }
  0x6e   : > { %3220 = vmatpush3.bf16.msra.mxu0 %v2720_v53  ;;  %v2783_v53 = vld [vmem:[%s4157_s3 + $0x308] sm:$0xff]  }
  0x6f   : > { %3222 = vmatprep.subr.bf16.mxu0 %v2729_v54  ;;  %v2744_v54 = vld [vmem:[%s4157_s3 + $0x1d0] sm:$0xff]  }
  0x72   : > { %3224 = vmatpush3.bf16.msra.mxu0 %v2721_v55  ;;  %v2792_v55 = vld [vmem:[%s4157_s3 + $0x350] sm:$0xff]  }
  0x73   : > { %3226 = vmatprep.subr.bf16.mxu0 %v2730_v56  ;;  %v2736_v56 = vld [vmem:[%s4157_s3 + $0x190] sm:$0xff]  }
  0x76   : > { %3228 = vmatpush3.bf16.msra.mxu0 %v2722_v57  ;;  %v2784_v57 = vld [vmem:[%s4157_s3 + $0x310] sm:$0xff]  }
  0x77   : > { %3230 = vmatprep.subr.bf16.mxu0 %v2731_v58  ;;  %v2745_v58 = vld [vmem:[%s4157_s3 + $0x1d8] sm:$0xff]  }
  0x7a   : > { %3232 = vmatpush3.bf16.msra.mxu0 %v2723_v59  ;;  %v2793_v59 = vld [vmem:[%s4157_s3 + $0x358] sm:$0xff]  }
  0x7b   : > { %3234 = vmatprep.subr.bf16.mxu0 %v2732_v60  ;;  %v2737_v60 = vld [vmem:[%s4157_s3 + $0x198] sm:$0xff]  }
  0x7e   : > { %3236 = vmatpush3.bf16.msra.mxu0 %v2724_v61  ;;  %v2785_v61 = vld [vmem:[%s4157_s3 + $0x318] sm:$0xff]  }
  0x7f   : > { %3238 = vmatprep.subr.bf16.mxu0 %v2733_v63  ;;  %v2794_v63 = vld [vmem:[%s4157_s3 + $0x360] sm:$0xff]  }
  0x82   : > { %3240 = vmatpush3.bf16.msra.mxu0 %v2725_v1  ;;  %v2786_v1 = vld [vmem:[%s4157_s3 + $0x320] sm:$0xff]  }
  0x83   : > { %3274 = vmatprep.subr.bf16.mxu0 %v2758_v3  ;;  %v2795_v3 = vld [vmem:[%s4157_s3 + $0x368] sm:$0xff]  }
 0x138   : > { %v3743_v4 = vpop.f32.mrb[0].mxu0 }
 0x139   : > { %v3745_v5 = vpop.f32.mrb[1].mxu0  ;;  %v519_v10 = vrot.slane %v3743_v4, 1  ;;  %v728_v12 = vrot.slane %v3743_v4, 2  ;;  %v1008_v45 = vrot.slane %v3743_v4, 4 }
 0x13a   : > { %v3747_v6 = vpop.f32.mrb[2].mxu0  ;;  %v520_v7 = vrot.slane %v3745_v5, 1  ;;  %v729_v8 = vrot.slane %v3745_v5, 2  ;;  %v1009_v14 = vrot.slane %v3745_v5, 4  ;;  %v869_v47 = vrot.slane %v3745_v5, 3 }
 0x13b   : > { %v3751_v9 = vpop.f32.mrb[3].mxu0  ;;  %v1289_v49 = vrot.slane %v3745_v5, 6 }
 0x13c   : > { %587 = vmatprep.mubr.f32.mxu1 %v520_v7  ;;  %796 = vmatprep.mubr.f32.mxu0 %v729_v8  ;;  %v2739_v7 = vld [vmem:[%s4157_s3 + $0x1a8] sm:$0xff]  }
 0x13d   : > { %588 = vmatmul.mubr.f32.vlgmr.msra.gmra.mrb[0].mxu1 %v519_v10  ;;  %797 = vmatmul.mubr.f32.vlgmr.msra.gmra.mrb[4].mxu0 %v728_v12  ;;  %v2787_v8 = vld [vmem:[%s4157_s3 + $0x328] sm:$0xff]   ;;  %v2748_v10 = vld [vmem:[%s4157_s3 + $0x1f0] sm:$0xff]  }
 0x13e   : > { %3180 = vmatpush3.bf16.msra.mxu1 %v2112_v11  ;;  %3276 = vmatpush3.bf16.msra.mxu0 %v2750_v13  ;;  %v2796_v11 = vld [vmem:[%s4157_s3 + $0x370] sm:$0xff]  }
 0x13f   : > { %657 = vmatprep.mubr.f32.mxu1 %v3745_v5  ;;  %1076 = vmatprep.mubr.f32.mxu0 %v1009_v14  ;;  %v2740_v12 = vld [vmem:[%s4157_s3 + $0x1b0] sm:$0xff]   ;;  %v2749_v14 = vld [vmem:[%s4157_s3 + $0x1f8] sm:$0xff]  }
 0x140   : > { %3182 = vmatprep.subr.bf16.mxu1 %v2695_v15  ;;  %3278 = vmatprep.subr.bf16.mxu0 %v2759_v16  ;;  %v2788_v13 = vld [vmem:[%s4157_s3 + $0x330] sm:$0xff]   ;;  %v2797_v15 = vld [vmem:[%s4157_s3 + $0x378] sm:$0xff]  }
 0x141   : > { %v2741_v16 = vld [vmem:[%s4157_s3 + $0x1b8] sm:$0xff]  }
 0x142   : > { %3184 = vmatpush3.bf16.msra.mxu1 %v2687_v17  ;;  %3280 = vmatpush3.bf16.msra.mxu0 %v2751_v18  ;;  %v2789_v17 = vld [vmem:[%s4157_s3 + $0x338] sm:$0xff]   ;;  %v2774_v18 = vld [vmem:[%s4157_s3 + $0x2c0] sm:$0xff]  }
 0x143   : > { %3186 = vmatprep.subr.bf16.mxu1 %v2696_v19  ;;  %3282 = vmatprep.subr.bf16.mxu0 %v2760_v20  ;;  %v2822_v19 = vld [vmem:[%s4157_s3 + $0x440] sm:$0xff]   ;;  %v868_v20 = vrot.slane %v3743_v4, 3 }
 0x146   : > { %3188 = vmatpush3.bf16.msra.mxu1 %v2688_v21  ;;  %3284 = vmatpush3.bf16.msra.mxu0 %v2752_v22  ;;  %v2766_v21 = vld [vmem:[%s4157_s3 + $0x280] sm:$0xff]   ;;  %v1288_v22 = vrot.slane %v3743_v4, 6 }
 0x147   : > { %3190 = vmatprep.subr.bf16.mxu1 %v2697_v23  ;;  %3286 = vmatprep.subr.bf16.mxu0 %v2761_v24  ;;  %v2814_v23 = vld [vmem:[%s4157_s3 + $0x400] sm:$0xff]   ;;  %v1149_v24 = vrot.slane %v3745_v5, 5 }
 0x14a   : > { %3192 = vmatpush3.bf16.msra.mxu1 %v2689_v25  ;;  %3288 = vmatpush3.bf16.msra.mxu0 %v2753_v26  ;;  %v2775_v25 = vld [vmem:[%s4157_s3 + $0x2c8] sm:$0xff]  }
 0x14b   : > { %3194 = vmatprep.subr.bf16.mxu1 %v2698_v27  ;;  %3290 = vmatprep.subr.bf16.mxu0 %v2762_v28  ;;  %v2823_v26 = vld [vmem:[%s4157_s3 + $0x448] sm:$0xff]  }
 0x14c   : > { %v2767_v27 = vld [vmem:[%s4157_s3 + $0x288] sm:$0xff]  }
 0x14d   : > { %v2815_v28 = vld [vmem:[%s4157_s3 + $0x408] sm:$0xff]  }
 0x14e   : > { %3196 = vmatpush3.bf16.msra.mxu1 %v2690_v29  ;;  %3292 = vmatpush3.bf16.msra.mxu0 %v2754_v30  ;;  %v2776_v29 = vld [vmem:[%s4157_s3 + $0x2d0] sm:$0xff]  }
 0x14f   : > { %3198 = vmatprep.subr.bf16.mxu1 %v2699_v31  ;;  %3294 = vmatprep.subr.bf16.mxu0 %v2763_v32  ;;  %v2824_v30 = vld [vmem:[%s4157_s3 + $0x450] sm:$0xff]   ;;  %v2777_v32 = vld [vmem:[%s4157_s3 + $0x2d8] sm:$0xff]  }
 0x150   : > { %v2816_v31 = vld [vmem:[%s4157_s3 + $0x410] sm:$0xff]  }
 0x152   : > { %3200 = vmatpush3.bf16.msra.mxu1 %v2691_v33  ;;  %3296 = vmatpush3.bf16.msra.mxu0 %v2755_v34  ;;  %v2825_v33 = vld [vmem:[%s4157_s3 + $0x458] sm:$0xff]  }
 0x153   : > { %3202 = vmatprep.subr.bf16.mxu1 %v2700_v35  ;;  %3298 = vmatprep.subr.bf16.mxu0 %v2764_v36  ;;  %v2769_v34 = vld [vmem:[%s4157_s3 + $0x298] sm:$0xff]   ;;  %v2778_v36 = vld [vmem:[%s4157_s3 + $0x2e0] sm:$0xff]  }
 0x154   : > { %v2817_v35 = vld [vmem:[%s4157_s3 + $0x418] sm:$0xff]  }
 0x156   : > { %3204 = vmatpush3.bf16.msra.mxu1 %v2692_v37  ;;  %3300 = vmatpush3.bf16.msra.mxu0 %v2756_v38  ;;  %v2826_v37 = vld [vmem:[%s4157_s3 + $0x460] sm:$0xff]  }
 0x157   : > { %3206 = vmatprep.subr.bf16.mxu1 %v2701_v39  ;;  %3302 = vmatprep.subr.bf16.mxu0 %v2765_v40  ;;  %v2770_v38 = vld [vmem:[%s4157_s3 + $0x2a0] sm:$0xff]   ;;  %v2779_v40 = vld [vmem:[%s4157_s3 + $0x2e8] sm:$0xff]  }
 0x158   : > { %v2818_v39 = vld [vmem:[%s4157_s3 + $0x420] sm:$0xff]  }
 0x15a   : > { %3208 = vmatpush3.bf16.msra.mxu1 %v2693_v41  ;;  %3304 = vmatpush3.bf16.msra.mxu0 %v2757_v42  ;;  %v2827_v41 = vld [vmem:[%s4157_s3 + $0x468] sm:$0xff]  }
 0x15b   : > { %3242 = vmatprep.subr.bf16.mxu1 %v2742_v43  ;;  %3338 = vmatprep.subr.bf16.mxu0 %v2790_v44  ;;  %v2771_v42 = vld [vmem:[%s4157_s3 + $0x2a8] sm:$0xff]   ;;  %v2780_v44 = vld [vmem:[%s4157_s3 + $0x2f0] sm:$0xff]  }
 0x15c   : > { %v2819_v43 = vld [vmem:[%s4157_s3 + $0x428] sm:$0xff]  }
 0x15d   : > { %658 = vmatmul.mubr.f32.vlgmr.msra.gmra.mrb[2].mxu1 %v3743_v4  ;;  %1077 = vmatmul.mubr.f32.vlgmr.msra.gmra.mrb[6].mxu0 %v1008_v45  ;;  %v2828_v45 = vld [vmem:[%s4157_s3 + $0x470] sm:$0xff]  }
 0x15e   : > { %3244 = vmatpush3.bf16.msra.mxu1 %v2734_v46  ;;  %936 = vmatprep.mubr.f32.mxu1 %v869_v47  ;;  %v2772_v46 = vld [vmem:[%s4157_s3 + $0x2b0] sm:$0xff]  }
 0x15f   : > { %3340 = vmatpush3.bf16.msra.mxu0 %v2782_v48  ;;  %1356 = vmatprep.mubr.f32.mxu0 %v1289_v49  ;;  %v2820_v47 = vld [vmem:[%s4157_s3 + $0x430] sm:$0xff]   ;;  %v2781_v48 = vld [vmem:[%s4157_s3 + $0x2f8] sm:$0xff]  }
 0x160   : > { %3246 = vmatprep.subr.bf16.mxu1 %v2743_v50  ;;  %3342 = vmatprep.subr.bf16.mxu0 %v2791_v51  ;;  %v2829_v49 = vld [vmem:[%s4157_s3 + $0x478] sm:$0xff]  }
 0x161   : > { %v2773_v50 = vld [vmem:[%s4157_s3 + $0x2b8] sm:$0xff]  }
 0x162   : > { %3248 = vmatpush3.bf16.msra.mxu1 %v2735_v52  ;;  %v2821_v51 = vld [vmem:[%s4157_s3 + $0x438] sm:$0xff]   ;;  %v2806_v52 = vld [vmem:[%s4157_s3 + $0x3c0] sm:$0xff]  }
 0x163   : > { %3344 = vmatpush3.bf16.msra.mxu0 %v2783_v53  ;;  %3250 = vmatprep.subr.bf16.mxu1 %v2744_v54  ;;  %v1148_v53 = vrot.slane %v3743_v4, 5  ;;  %v2798_v54 = vld [vmem:[%s4157_s3 + $0x380] sm:$0xff]  }
 0x164   : > { %3346 = vmatprep.subr.bf16.mxu0 %v2792_v55  ;;  %v2807_v55 = vld [vmem:[%s4157_s3 + $0x3c8] sm:$0xff]  }
 0x166   : > { %3252 = vmatpush3.bf16.msra.mxu1 %v2736_v56  ;;  %v1429_v56 = vrot.slane %v3745_v5, 7  ;;  %v2809_v5 = vld [vmem:[%s4157_s3 + $0x3d8] sm:$0xff]  }
 0x167   : > { %3348 = vmatpush3.bf16.msra.mxu0 %v2784_v57  ;;  %3254 = vmatprep.subr.bf16.mxu1 %v2745_v58  ;;  %v2799_v57 = vld [vmem:[%s4157_s3 + $0x388] sm:$0xff]   ;;  %v2808_v58 = vld [vmem:[%s4157_s3 + $0x3d0] sm:$0xff]  }
 0x168   : > { %3350 = vmatprep.subr.bf16.mxu0 %v2793_v59  ;;  %v2800_v59 = vld [vmem:[%s4157_s3 + $0x390] sm:$0xff]  }
 0x16a   : > { %3256 = vmatpush3.bf16.msra.mxu1 %v2737_v60  ;;  %v2810_v60 = vld [vmem:[%s4157_s3 + $0x3e0] sm:$0xff]  }
 0x16b   : > { %3352 = vmatpush3.bf16.msra.mxu0 %v2785_v61  ;;  %3258 = vmatprep.subr.bf16.mxu1 %v2746_v62  ;;  %v2802_v61 = vld [vmem:[%s4157_s3 + $0x3a0] sm:$0xff]   ;;  %v2811_v62 = vld [vmem:[%s4157_s3 + $0x3e8] sm:$0xff]  }
 0x16c   : > { %3354 = vmatprep.subr.bf16.mxu0 %v2794_v63  ;;  %v2803_v63 = vld [vmem:[%s4157_s3 + $0x3a8] sm:$0xff]  }
 0x16e   : > { %3260 = vmatpush3.bf16.msra.mxu1 %v2738_v0  ;;  %v2812_v0 = vld [vmem:[%s4157_s3 + $0x3f0] sm:$0xff]  }
 0x16f   : > { %3356 = vmatpush3.bf16.msra.mxu0 %v2786_v1  ;;  %3262 = vmatprep.subr.bf16.mxu1 %v2747_v2  ;;  %v2804_v1 = vld [vmem:[%s4157_s3 + $0x3b0] sm:$0xff]   ;;  %v2813_v2 = vld [vmem:[%s4157_s3 + $0x3f8] sm:$0xff]  }
 0x170   : > { %3358 = vmatprep.subr.bf16.mxu0 %v2795_v3  ;;  %v2805_v3 = vld [vmem:[%s4157_s3 + $0x3b8] sm:$0xff]  }
 0x172   : > { %3264 = vmatpush3.bf16.msra.mxu1 %v2739_v7  ;;  %v1428_v7 = vrot.slane %v3743_v4, 7  ;;  %v1648_v4 = vld [vmem:[%s4158_s4 + $0x28] sm:$0xff] }
 0x173   : > { %3360 = vmatpush3.bf16.msra.mxu0 %v2787_v8  ;;  %3266 = vmatprep.subr.bf16.mxu1 %v2748_v10  ;;  %v1644_v8 = vld [vmem:[%s4158_s4 + $0x8] sm:$0xff]  ;;  %v1646_v10 = vld [vmem:[%s4158_s4 + $0x18] sm:$0xff] }
 0x174   : > { %3362 = vmatprep.subr.bf16.mxu0 %v2796_v11  ;;  %v1643_v11 = vld [vmem:[%s4158_s4] sm:$0xff] }
 0x176   : > { %3268 = vmatpush3.bf16.msra.mxu1 %v2740_v12  ;;  %v3433_v12 = vpack.c.bf16 %v1646_v10, %v1644_v8 }
 0x177   : > { %3364 = vmatpush3.bf16.msra.mxu0 %v2788_v13  ;;  %3270 = vmatprep.subr.bf16.mxu1 %v2749_v14  ;;  %v1645_v13 = vld [vmem:[%s4158_s4 + $0x10] sm:$0xff] }
 0x178   : > { %3366 = vmatprep.subr.bf16.mxu0 %v2797_v15  ;;  %v3435_v14 = vpack.c.bf16 %v1645_v13, %v1643_v11  ;;  %v1650_v15 = vld [vmem:[%s4158_s4 + $0x38] sm:$0xff] }
 0x17a   : > { %3272 = vmatpush3.bf16.msra.mxu1 %v2741_v16 }
 0x17b   : > { %3368 = vmatpush3.bf16.msra.mxu0 %v2789_v17  ;;  %3306 = vmatprep.subr.bf16.mxu1 %v2774_v18  ;;  %v3437_v18 = vpack.c.bf16 %v1650_v15, %v1648_v4 }
 0x17c   : > { %3402 = vmatprep.subr.bf16.mxu0 %v2822_v19  ;;  %v1647_v19 = vld [vmem:[%s4158_s4 + $0x20] sm:$0xff] }
 0x17d   : > { %937 = vmatmul.mubr.f32.vlgmr.msra.gmra.mrb[4].mxu1 %v868_v20  ;;  %v1649_v20 = vld [vmem:[%s4158_s4 + $0x30] sm:$0xff] }
 0x17e   : > { %1357 = vmatmul.mubr.f32.vlgmr.msra.gmra.mrb[8].mxu0 %v1288_v22  ;;  %3308 = vmatpush3.bf16.msra.mxu1 %v2766_v21 }
 0x17f   : > { %1216 = vmatprep.mubr.f32.mxu1 %v1149_v24  ;;  %3404 = vmatpush3.bf16.msra.mxu0 %v2814_v23  ;;  %v3439_v23 = vpack.c.bf16 %v1649_v20, %v1647_v19  ;;  %v1754_v20 = vlaneseq }
 0x180   : > { %1632 = vmatprep.mubr.f32.mxu0 %v3751_v9  ;;  %3310 = vmatprep.subr.bf16.mxu1 %v2775_v25  ;;  %v2768_v9 = vld [vmem:[%s4157_s3 + $0x290] sm:$0xff]  }
 0x181   : > { %3406 = vmatprep.subr.bf16.mxu0 %v2823_v26  ;;  %v1652_v26 = vld [vmem:[%s4158_s4 + $0x48] sm:$0xff]  ;;  %vm1768_vm1 = vcmp.lt.s32.totalorder %v1754_v20, 256 }
 0x182   : > { %3312 = vmatpush3.bf16.msra.mxu1 %v2767_v27  ;;  %v1654_v27 = vld [vmem:[%s4158_s4 + $0x58] sm:$0xff] }
 0x183   : > { %3408 = vmatpush3.bf16.msra.mxu0 %v2815_v28  ;;  %3314 = vmatprep.subr.bf16.mxu1 %v2776_v29  ;;  %v3441_v28 = vpack.c.bf16 %v1654_v27, %v1652_v26  ;;  %v1651_v29 = vld [vmem:[%s4158_s4 + $0x40] sm:$0xff] }
 0x184   : > { %3410 = vmatprep.subr.bf16.mxu0 %v2824_v30  ;;  %v1653_v30 = vld [vmem:[%s4158_s4 + $0x50] sm:$0xff] }
 0x186   : > { %3316 = vmatpush3.bf16.msra.mxu1 %v2768_v9  ;;  %v3443_v9 = vpack.c.bf16 %v1653_v30, %v1651_v29 }
 0x187   : > { %3412 = vmatpush3.bf16.msra.mxu0 %v2816_v31  ;;  %3318 = vmatprep.subr.bf16.mxu1 %v2777_v32  ;;  %v1656_v31 = vld [vmem:[%s4158_s4 + $0x68] sm:$0xff]  ;;  %v1658_v32 = vld [vmem:[%s4158_s4 + $0x78] sm:$0xff] }
 0x188   : > { %3414 = vmatprep.subr.bf16.mxu0 %v2825_v33  ;;  %v3445_v33 = vpack.c.bf16 %v1658_v32, %v1656_v31 }
 0x18a   : > { %3320 = vmatpush3.bf16.msra.mxu1 %v2769_v34  ;;  %v1655_v34 = vld [vmem:[%s4158_s4 + $0x60] sm:$0xff] }
 0x18b   : > { %3416 = vmatpush3.bf16.msra.mxu0 %v2817_v35  ;;  %3322 = vmatprep.subr.bf16.mxu1 %v2778_v36  ;;  %v1657_v35 = vld [vmem:[%s4158_s4 + $0x70] sm:$0xff] }
 0x18c   : > { %3418 = vmatprep.subr.bf16.mxu0 %v2826_v37  ;;  %v3447_v36 = vpack.c.bf16 %v1657_v35, %v1655_v34  ;;  %v3509_v37 = vmov 0.0  }
 0x18e   : > { %3324 = vmatpush3.bf16.msra.mxu1 %v2770_v38 }
 0x18f   : > { %3420 = vmatpush3.bf16.msra.mxu0 %v2818_v39  ;;  %3326 = vmatprep.subr.bf16.mxu1 %v2779_v40 }
 0x190   : > { %3422 = vmatprep.subr.bf16.mxu0 %v2827_v41 }
 0x192   : > { %3328 = vmatpush3.bf16.msra.mxu1 %v2771_v42 }
 0x193   : > { %3424 = vmatpush3.bf16.msra.mxu0 %v2819_v43  ;;  %3330 = vmatprep.subr.bf16.mxu1 %v2780_v44 }
 0x194   : > { %3426 = vmatprep.subr.bf16.mxu0 %v2828_v45 }
 0x196   : > { %3332 = vmatpush3.bf16.msra.mxu1 %v2772_v46 }
 0x197   : > { %3428 = vmatpush3.bf16.msra.mxu0 %v2820_v47  ;;  %3334 = vmatprep.subr.bf16.mxu1 %v2781_v48 }
 0x198   : > { %3430 = vmatprep.subr.bf16.mxu0 %v2829_v49 }
 0x19a   : > { %3336 = vmatpush3.bf16.msra.mxu1 %v2773_v50 }
 0x19b   : > { %3432 = vmatpush3.bf16.msra.mxu0 %v2821_v51  ;;  %3370 = vmatprep.subr.bf16.mxu1 %v2806_v52 }
 0x19d   : > { %1217 = vmatmul.mubr.f32.vlgmr.msra.gmra.mrb[6].mxu1 %v1148_v53 }
 0x19e   : > { %1633 = vmatmul.mubr.f32.vlgmr.msra.gmra.mrb[10].mxu0 %v3747_v6  ;;  %3372 = vmatpush3.bf16.msra.mxu1 %v2798_v54  ;;  %v2801_v6 = vld [vmem:[%s4157_s3 + $0x398] sm:$0xff]  }
 0x19f   : > { %1496 = vmatprep.mubr.f32.mxu1 %v1429_v56  ;;  %3374 = vmatprep.subr.bf16.mxu1 %v2807_v55 }
 0x1a2   : > { %3376 = vmatpush3.bf16.msra.mxu1 %v2799_v57 }
 0x1a3   : > { %3378 = vmatprep.subr.bf16.mxu1 %v2808_v58 }
 0x1a6   : > { %3380 = vmatpush3.bf16.msra.mxu1 %v2800_v59 }
 0x1a7   : > { %3382 = vmatprep.subr.bf16.mxu1 %v2809_v5 }
 0x1aa   : > { %3384 = vmatpush3.bf16.msra.mxu1 %v2801_v6 }
 0x1ab   : > { %3386 = vmatprep.subr.bf16.mxu1 %v2810_v60 }
 0x1ae   : > { %3388 = vmatpush3.bf16.msra.mxu1 %v2802_v61 }
 0x1af   : > { %3390 = vmatprep.subr.bf16.mxu1 %v2811_v62 }
 0x1b2   : > { %3392 = vmatpush3.bf16.msra.mxu1 %v2803_v63 }
 0x1b3   : > { %3394 = vmatprep.subr.bf16.mxu1 %v2812_v0  ;;  %v1640_v0 = vstv %s1639_s7 }
 0x1b6   : > { %3396 = vmatpush3.bf16.msra.mxu1 %v2804_v1 }
 0x1b7   : > { %3398 = vmatprep.subr.bf16.mxu1 %v2813_v2 }
 0x1ba   : > { %3400 = vmatpush3.bf16.msra.mxu1 %v2805_v3 }
 0x1bb   : > { %3434 = vmatprep.subr.bf16.mxu1 %v3433_v12 }
 0x1bd   : > { %1497 = vmatmul.mubr.f32.vlgmr.msra.gmra.mrb[8].mxu1 %v1428_v7  ;;  %v1660_v7 = vstv %s2104_s8 }
 0x1be   : > { %3436 = vmatpush1.bf16.msra.mxu1 %v3435_v14  ;;  %1729 = vmatprep.mubr.f32.mxu1 %v3509_v37 }
 0x1bf   : > { %3438 = vmatprep.subr.bf16.mxu1 %v3437_v18  ;;  %v3510_v18 = vmov 1966171168  }
 0x1c0   : > { %v1752_v19 = vunpack.c.l.s4 %v3510_v18 }
 0x1c2   : > { %3440 = vmatpush1.bf16.msra.mxu1 %v3439_v23 }
 0x1c3   : > { %3442 = vmatprep.subr.bf16.mxu1 %v3441_v28 }
 0x1c6   : > { %3444 = vmatpush1.bf16.msra.mxu1 %v3443_v9 }
 0x1c7   : > { %3446 = vmatprep.subr.bf16.mxu1 %v3445_v33 }
 0x1ca   : > { %3448 = vmatpush1.bf16.msra.mxu1 %v3447_v36 }
 0x210   : > { %v2862_v16 = vpop.f32.mrb[0].mxu1  ;;  %v2932_v17 = vpop.f32.mrb[4].mxu0 }
 0x211   : > { %v2863_v21 = vpop.f32.mrb[1].mxu1  ;;  %v2933_v22 = vpop.f32.mrb[5].mxu0 }
 0x212   : > { %v2864_v24 = vadd.f32 %v2863_v21, %v2862_v16  ;;  %v2934_v25 = vadd.f32 %v2933_v22, %v2932_v17  ;;  %v1753_v21 = vunpack.c.0.s8 %v1752_v19  ;;  %v1755_v22 = vshrl.u32 %v1754_v20, 7 }
 0x230   : > { %v2897_v38 = vpop.f32.mrb[2].mxu1  ;;  %v3002_v39 = vpop.f32.mrb[6].mxu0 }
 0x231   : > { %v2898_v40 = vpop.f32.mrb[3].mxu1  ;;  %v3003_v41 = vpop.f32.mrb[7].mxu0 }
 0x232   : > { %v2899_v42 = vadd.f32 %v2898_v40, %v2897_v38  ;;  %v3004_v43 = vadd.f32 %v3003_v41, %v3002_v39 }
 0x234   : > { %v660_v44 = vadd.f32 %v2899_v42, %v2864_v24  ;;  %v1756_v24 = vsub.s32 %v1753_v21, %v1755_v22 }
 0x236   : > { %v802_v45 = vadd.f32 %v2934_v25, %v660_v44 }
 0x250   : > { %v2967_v46 = vpop.f32.mrb[4].mxu1 }
 0x251   : > { %v3072_v47 = vpop.f32.mrb[8].mxu0  ;;  %v2968_v48 = vpop.f32.mrb[5].mxu1 }
 0x252   : > { %v2969_v49 = vadd.f32 %v2968_v48, %v2967_v46  ;;  %v3073_v50 = vpop.f32.mrb[9].mxu0 }
 0x253   : > { %v3074_v51 = vadd.f32 %v3073_v50, %v3072_v47 }
 0x254   : > { %v942_v52 = vadd.f32 %v2969_v49, %v802_v45 }
 0x256   : > { %v1082_v53 = vadd.f32 %v3004_v43, %v942_v52 }
 0x270   : > { %v3037_v54 = vpop.f32.mrb[6].mxu1 }
 0x271   : > { %v3142_v55 = vpop.f32.mrb[10].mxu0  ;;  %v3038_v56 = vpop.f32.mrb[7].mxu1 }
 0x272   : > { %v3039_v57 = vadd.f32 %v3038_v56, %v3037_v54  ;;  %v3143_v58 = vpop.f32.mrb[11].mxu0 }
 0x273   : > { %v3144_v59 = vadd.f32 %v3143_v58, %v3142_v55 }
 0x274   : > { %v1222_v5 = vadd.f32 %v3039_v57, %v1082_v53 }
 0x276   : > { %v1362_v6 = vadd.f32 %v3074_v51, %v1222_v5 }
 0x290   : > { %v3107_v60 = vpop.f32.mrb[8].mxu1 }
 0x291   : > { %v3108_v61 = vpop.f32.mrb[9].mxu1 }
 0x292   : > { %v3109_v62 = vadd.f32 %v3108_v61, %v3107_v60 }
 0x294   : > { %v1502_v63 = vadd.f32 %v3109_v62, %v1362_v6 }
 0x296   : > { %v1638_v1 = vadd.f32 %v3144_v59, %v1502_v63 }
 0x298   : > { %v1641_v2 = vadd.f32 %v1640_v0, %v1638_v1 }
 0x29a   : > { %v1642_v3 = vmax.f32 %v1641_v2, 0.0 }
 0x29c   : > { %2105 = vmatmul.mubr.msk.f32.vlgmr.msra.gmra.mrb[10].mxu1 %vm1661_vm0, %v1642_v3 }
 0x36f   : > { %v1731_v8 = vpop.f32.mrb[10].mxu1 }
 0x370   : > { %v1732_v10 = vadd.f32 %v1731_v8, %v1660_v7  ;;  %v1733_v11 = vpop.f32.mrb[11].mxu1 }
 0x371   : > { %v1734_v12 = vadd.f32 %v1733_v11, %v1660_v7 }
 0x372   : > { %v2106_v13 = vmul.f32 -1.442695, %v1732_v10 }
 0x373   : > { %v2107_v14 = vmul.f32 -1.442695, %v1734_v12 }
 0x374   : > { %3473 = vpow2.f32 %v2106_v13 }
 0x375   : > { %3475 = vpow2.f32 %v2107_v14 }
 0x37e   : > { %v3474_v4 = vpop.eup %3473 }
 0x37f   : > { %v3476_v15 = vpop.eup %3475  ;;  %v1742_v16 = vadd.f32 1.0, %v3474_v4 }
 0x380   : > { %v1743_v17 = vadd.f32 1.0, %v3476_v15 }
 0x381   : > { %3477 = vrcp.f32 %v1742_v16 }
 0x382   : > { %3479 = vrcp.f32 %v1743_v17 }
 0x38b   : > { %v3478_v23 = vpop.eup %3477 }
 0x38c   : > { %v3480_v25 = vpop.eup %3479 }
 0x38d   : > { %v1750_v26 = vcombine.low %v3478_v23, %v3480_v25 }
 0x38f   : > { %v1757_v27 = vrot.slane %v1750_v26, %v1756_v24 }
 0x391   : > { %v1764_v28 = vrot.slane %v1757_v27, %v1756_v24 }
 0x393   : > { %1770 = vst.msk [vmem:[%s236_s12] sm:$0x3] %vm1768_vm1, %v1764_v28 }
 0x394 PF: > { %s16_s18 = sadd.s32 1, %s3506_s18  }
 0x395   : > { %p13_p1 = scmp.ge.s32.totalorder %s16_s18, 4  }
 0x397   :  { %15 = sbr.rel (!%p13_p1) target bundleno = 1 (0x1), region = 83 }
 0x39e   :  { %1790 = vsyncpa [#allocation3], 1 }
 0x39f   :  { %1792 = vsyncpa [#allocation3 + $0x1], 1 }

</bundles_post_ra>
